<compile_context>
chip_gen: v7x
topology: tpu7x:2x2x1
jax: 0.10.0
libtpu: 0.0.40
codegen_flags: <defaults>
</compile_context>

<pallas_src>
import jax
import jax.numpy as jnp
from jax import lax
from jax.experimental import pallas as pl
from jax.experimental.pallas import tpu as pltpu


_LANE = 128
_SUBLANE = 8
_WEIGHT_TILE_BUDGET = 8 * 1024 * 1024   # max weight-tile bytes (double-buffered by Pallas)
_PAD_COPY_BUDGET = 4 * 1024 * 1024      # below this a padded weight copy is negligible
_VMEM_LIMIT_CAP = 48 * 1024 * 1024      # leave headroom inside v7x's 64 MiB / TensorCore


def _round_up(x: int, m: int) -> int:
    return ((x + m - 1) // m) * m


def _round_down(x: int, m: int) -> int:
    return (x // m) * m


def _vmem_limit(live_bytes: int) -> int:
    # Generous 1.5x margin over the live-buffer estimate, floored above the
    # v5e (16 MiB) / v6e (32 MiB) scoped defaults only as far as needed and
    # capped so v7x (64 MiB physical) keeps headroom.
    return int(min(_VMEM_LIMIT_CAP, max(16 * 1024 * 1024, int(1.5 * live_bytes) + (2 << 20))))


def _linear_kernel(x_ref, w_ref, b_ref, o_ref):
    """One class tile, full feature dim: o = x @ w.T + b (no reduction axis)."""
    # x_ref: (B, D) resident VMEM; w_ref: (tn, D) native nn.Linear layout;
    # b_ref: (1, tn); o_ref: (B, tn). Transposed-RHS contraction on the MXU.
    o_ref[...] = (
        lax.dot_general(
            x_ref[...],
            w_ref[...],
            dimension_numbers=(((1,), (1,)), ((), ())),
            preferred_element_type=jnp.float32,
        )
        + b_ref[...]
    ).astype(o_ref.dtype)


def _linear_kernel_ktiled(x_ref, w_ref, b_ref, o_ref, acc_ref):
    """Fallback for very large input_dim: K-tiled reduction with f32 accumulator."""
    k = pl.program_id(1)

    @pl.when(k == 0)
    def _():
        # Fold the bias into the accumulator init (no separate finalize add).
        acc_ref[...] = jnp.broadcast_to(b_ref[...], acc_ref.shape)

    acc_ref[...] += lax.dot_general(
        x_ref[...],
        w_ref[...],
        dimension_numbers=(((1,), (1,)), ((), ())),
        preferred_element_type=jnp.float32,
    )

    @pl.when(k == pl.num_programs(1) - 1)
    def _():
        o_ref[...] = acc_ref[...].astype(o_ref.dtype)


def classification_head(x: jax.Array, weight: jax.Array, bias: jax.Array,
                        *, param_dtype=None) -> jax.Array:
    """Pallas implementation of ClassificationHead.forward (logits = x @ W.T + b).

    param_dtype: optionally stream x/W as e.g. jnp.bfloat16 (f32 accumulation).
    """
    batch, input_dim = x.shape
    num_classes, w_in = weight.shape
    assert w_in == input_dim
    assert bias.shape == (num_classes,)

    out_dtype = x.dtype
    if param_dtype is not None:
        x = x.astype(param_dtype)
        weight = weight.astype(param_dtype)
    bias = bias.astype(jnp.float32)

    itemsize = jnp.dtype(weight.dtype).itemsize
    c128 = _round_up(num_classes, _LANE)
    d128 = _round_up(input_dim, _LANE)
    row_bytes = d128 * itemsize            # VMEM bytes of one (lane-padded) weight row

    cost = pl.CostEstimate(
        flops=2 * batch * num_classes * input_dim,
        transcendentals=0,
        bytes_accessed=itemsize * (batch * input_dim + num_classes * input_dim)
        + 4 * (num_classes + batch * num_classes),
    )

    # Path selection.
    small = (c128 * row_bytes <= _PAD_COPY_BUDGET) or (
        num_classes <= _LANE and _LANE * row_bytes <= _WEIGHT_TILE_BUDGET
    )
    full_d = _LANE * row_bytes <= _WEIGHT_TILE_BUDGET

    if small or full_d:
        if small:
            # Small head: pad to (8,128)-aligned shapes (copy is <= a few MiB)
            # so every matmul dimension is hardware-aligned. Single grid step.
            if d128 != input_dim:
                x = jnp.pad(x, ((0, 0), (0, d128 - input_dim)))
            if d128 != input_dim or c128 != num_classes:
                weight = jnp.pad(
                    weight, ((0, c128 - num_classes), (0, d128 - input_dim))
                )
            d_arr = d128
            tn = c128
        else:
            # Large head: never copy the weight. Full-D class tiles; the last
            # (partial) tile's garbage rows only feed output columns that are
            # >= num_classes, which get sliced off below.
            # TODO(synk): very large batch would also want a batch grid axis.
            d_arr = input_dim
            tn = max(_LANE, _round_down(_WEIGHT_TILE_BUDGET // row_bytes, _LANE))
            # Keep >= 2 class tiles so the v7x megacore engages both TensorCores.
            tn = min(tn, max(_LANE, _round_down(c128 // 2, _LANE)))

        n_tiles = (c128 + tn - 1) // tn
        c_out = n_tiles * tn
        b2 = bias if c_out == num_classes else jnp.pad(bias, (0, c_out - num_classes))
        b2 = b2.reshape(1, c_out)

        live = (
            2 * tn * row_bytes                           # double-buffered weight tile
            + 2 * batch * d128 * itemsize                # resident x
            + 2 * _round_up(batch, _SUBLANE) * tn * 4    # output tile
            + 2 * _SUBLANE * tn * 4                      # bias tile
        )

        out = pl.pallas_call(
            _linear_kernel,
            out_shape=jax.ShapeDtypeStruct((batch, c_out), out_dtype),
            grid_spec=pltpu.PrefetchScalarGridSpec(
                num_scalar_prefetch=0,
                grid=(n_tiles,),
                in_specs=[
                    pl.BlockSpec((batch, d_arr), lambda j: (0, 0)),  # x, resident
                    pl.BlockSpec((tn, d_arr), lambda j: (j, 0)),     # weight (C, D) tile
                    pl.BlockSpec((1, tn), lambda j: (0, j)),         # bias
                ],
                out_specs=pl.BlockSpec((batch, tn), lambda j: (0, j)),
            ),
            compiler_params=pltpu.CompilerParams(
                dimension_semantics=("parallel",),
                vmem_limit_bytes=_vmem_limit(live),
            ),
            cost_estimate=cost,
        )(x, weight, b2)

        if c_out != num_classes:
            out = out[:, :num_classes]
        return out

    # ---- Fallback: input_dim too large for a single full-D weight tile ----
    # TODO(synk): this rare path (roughly input_dim > 16K at f32) still pads
    # the weight so the K-reduction remainder is exactly zero.
    c_pad = c128
    d_pad = d128
    tn = 256 if c_pad % 256 == 0 else 128
    m = d_pad // _LANE
    budget_t = max(1, (_WEIGHT_TILE_BUDGET // (tn * itemsize)) // _LANE)
    tk_t = 1
    for cand in range(min(budget_t, m), 0, -1):
        if m % cand == 0:
            tk_t = cand
            break
    tk = tk_t * _LANE

    if d_pad != input_dim:
        x = jnp.pad(x, ((0, 0), (0, d_pad - input_dim)))
    if d_pad != input_dim or c_pad != num_classes:
        weight = jnp.pad(weight, ((0, c_pad - num_classes), (0, d_pad - input_dim)))
    b2 = bias if c_pad == num_classes else jnp.pad(bias, (0, c_pad - num_classes))
    b2 = b2.reshape(1, c_pad)

    live = (
        2 * tn * tk * itemsize
        + 2 * _round_up(batch, _SUBLANE) * tk * itemsize
        + 2 * _round_up(batch, _SUBLANE) * tn * 4
        + 2 * _SUBLANE * tn * 4
        + _round_up(batch, _SUBLANE) * tn * 4
    )

    out = pl.pallas_call(
        _linear_kernel_ktiled,
        out_shape=jax.ShapeDtypeStruct((batch, c_pad), out_dtype),
        grid_spec=pltpu.PrefetchScalarGridSpec(
            num_scalar_prefetch=0,
            grid=(c_pad // tn, d_pad // tk),
            in_specs=[
                pl.BlockSpec((batch, tk), lambda j, k: (0, k)),  # x
                pl.BlockSpec((tn, tk), lambda j, k: (j, k)),     # weight tile
                pl.BlockSpec((1, tn), lambda j, k: (0, j)),      # bias
            ],
            out_specs=pl.BlockSpec((batch, tn), lambda j, k: (0, j)),
            scratch_shapes=[pltpu.VMEM((batch, tn), jnp.float32)],
        ),
        compiler_params=pltpu.CompilerParams(
            dimension_semantics=("parallel", "arbitrary"),
            vmem_limit_bytes=_vmem_limit(live),
        ),
        cost_estimate=cost,
    )(x, weight, b2)

    if c_pad != num_classes:
        out = out[:, :num_classes]
    return out


if __name__ == "__main__":
    # Deterministic parameter/input construction at small shapes.
    batch = 2
    input_dim = 32
    num_classes = 8

    key = jax.random.PRNGKey(0)
    kx, kw, kb = jax.random.split(key, 3)

    x = jax.random.normal(kx, (batch, input_dim), dtype=jnp.float32)
    # nn.Linear shapes: weight (num_classes, input_dim), bias (num_classes,)
    bound = 1.0 / (input_dim ** 0.5)
    weight = jax.random.uniform(kw, (num_classes, input_dim),
                                minval=-bound, maxval=bound, dtype=jnp.float32)
    bias = jax.random.uniform(kb, (num_classes,),
                              minval=-bound, maxval=bound, dtype=jnp.float32)

    logits = jax.jit(classification_head)(x, weight, bias)
    jax.block_until_ready(logits)

    # Pure-JAX reference check.
    ref = x @ weight.T + bias
    assert logits.shape == (batch, num_classes)
    assert jnp.allclose(logits, ref, atol=1e-5, rtol=1e-5)

    print("KERNEL_OK")
</pallas_src>

<mosaic_0001>
module attributes {stable_mosaic.version = 11 : i64} {
  func.func @_linear_kernel(%arg0: i32, %arg1: memref<2x128xf32, #tpu.memory_space<vmem>>, %arg2: memref<128x128xf32, #tpu.memory_space<vmem>>, %arg3: memref<1x128xf32, #tpu.memory_space<vmem>>, %arg4: memref<2x128xf32, #tpu.memory_space<vmem>>) attributes {dimension_semantics = [#tpu.dimension_semantics<parallel>], iteration_bounds = array<i64: 1>, scalar_prefetch = 0 : i64, scratch_operands = 0 : i64, tpu.core_type = #tpu.core_type<tc>, window_params = [{pipeline_mode = #tpu.pipeline_mode<synchronous>, transform_indices = @transform_0, window_bounds = array<i64: 2, 128>}, {transform_indices = @transform_1, window_bounds = array<i64: 128, 128>}, {transform_indices = @transform_2, window_bounds = array<i64: 1, 128>}, {transform_indices = @transform_3, window_bounds = array<i64: 2, 128>}]} {
    %c0 = arith.constant 0 : index
    %c0_0 = arith.constant 0 : index
    %0 = vector.load %arg1[%c0, %c0_0] : memref<2x128xf32, #tpu.memory_space<vmem>>, vector<2x128xf32>
    %c0_1 = arith.constant 0 : index
    %c0_2 = arith.constant 0 : index
    %1 = vector.load %arg2[%c0_1, %c0_2] : memref<128x128xf32, #tpu.memory_space<vmem>>, vector<128x128xf32>
    %cst = arith.constant dense<0.000000e+00> : vector<2x128xf32>
    %2 = tpu.matmul %0, %1, %cst {dimension_numbers = #tpu.dot_dimension_numbers<[1], [1], [0], [0], [0, 0, 1, 0], [], []>} : vector<2x128xf32>, vector<128x128xf32>, vector<2x128xf32> -> vector<2x128xf32>
    %c0_3 = arith.constant 0 : index
    %c0_4 = arith.constant 0 : index
    %3 = vector.load %arg3[%c0_3, %c0_4] : memref<1x128xf32, #tpu.memory_space<vmem>>, vector<1x128xf32>
    %4 = vector.broadcast %3 : vector<1x128xf32> to vector<2x128xf32>
    %5 = arith.addf %2, %4 : vector<2x128xf32>
    %c0_5 = arith.constant 0 : index
    %c0_6 = arith.constant 0 : index
    %6 = vector.load %arg4[%c0_5, %c0_6] : memref<2x128xf32, #tpu.memory_space<vmem>>, vector<2x128xf32>
    tpu.vector_store %arg4[%c0_5, %c0_6], %5 {strides = array<i32>} : memref<2x128xf32, #tpu.memory_space<vmem>>, vector<2x128xf32>,
    return
  }
  func.func @transform_0(%arg0: i32) -> (i32, i32) {
    %c0_i32 = arith.constant 0 : i32
    %c0_i32_0 = arith.constant 0 : i32
    %c0_i32_1 = arith.constant 0 : i32
    return %c0_i32, %c0_i32_0 : i32, i32
  }
  func.func @transform_1(%arg0: i32) -> (i32, i32) {
    %c0_i32 = arith.constant 0 : i32
    %c0_i32_0 = arith.constant 0 : i32
    return %arg0, %c0_i32 : i32, i32
  }
  func.func @transform_2(%arg0: i32) -> (i32, i32) {
    %c0_i32 = arith.constant 0 : i32
    %c0_i32_0 = arith.constant 0 : i32
    return %c0_i32, %arg0 : i32, i32
  }
  func.func @transform_3(%arg0: i32) -> (i32, i32) {
    %c0_i32 = arith.constant 0 : i32
    %c0_i32_0 = arith.constant 0 : i32
    return %c0_i32, %arg0 : i32, i32
  }
}

</mosaic_0001>

<bundles_post_ra>
// kernel: classification_head.1
= control target key start
LH: loop header
LB: loop body
LE: loop exit
PB: predicated region body
PF: predicated region fallthrough
CT: control target
= control target key end

     0   :  { %v229_v2 = vmov 0.0|0.0   ;;  %vm230_vm0 = vmmov 0   ;;  %v231_v4 = vmov 0.0   ;;  %s319_s0 = inlined_call_operand.vmem [shape: f32[2,128], index: 0, kind: input, shape index: {}]   ;;  %s320_s1 = inlined_call_operand.vmem [shape: f32[128,128], index: 1, kind: input, shape index: {}]   ;;  %s321_s2 = inlined_call_operand.vmem [shape: f32[1,128], index: 2, kind: input, shape index: {}]   ;;  %s322_s3 = inlined_call_operand.hbm [shape: f32[2,128], index: 3, kind: output, shape index: {}]  }
   0x1   :  { %v16_v0 = vld [vmem:[%s320_s1] sm:$0xff]  ;;  %v17_v1 = vld [vmem:[%s320_s1 + $0x8] sm:$0xff]  ;;  %177 = vmatprep.subr.bf16.mxu0 %v229_v2  ;;  %174 = vmatprep.mubr.msk.f32.mxu0 %vm230_vm0, %v231_v4  ;;  %v18_v5 = vld [vmem:[%s320_s1 + $0x10] sm:$0xff] }
   0x2   :  { %v178_v3 = vpack.c.bf16 %v17_v1, %v16_v0  ;;  %v19_v6 = vld [vmem:[%s320_s1 + $0x18] sm:$0xff] }
   0x4   :  { %179 = vmatpush3.bf16.xpose.msra.mxu0 %v178_v3 }
   0x5   :  { %180 = vmatprep.subr.bf16.mxu0 %v229_v2 }
   0x6   :  { %8 = vsyncpa [#allocation3], 0  ;;  %v181_v7 = vpack.c.bf16 %v19_v6, %v18_v5  ;;  %v20_v8 = vld [vmem:[%s320_s1 + $0x20] sm:$0xff]  ;;  %v21_v9 = vld [vmem:[%s320_s1 + $0x28] sm:$0xff]  ;;  %s232_s21 = smov [#allocation2]  }
   0x7   :  { %v184_v10 = vpack.c.bf16 %v21_v9, %v20_v8  ;;  %v22_v11 = vld [vmem:[%s320_s1 + $0x30] sm:$0xff]  ;;  %v23_v12 = vld [vmem:[%s320_s1 + $0x38] sm:$0xff]  ;;  %v24_v14 = vld [vmem:[%s320_s1 + $0x40] sm:$0xff]  ;;  %s116_s22 = sshll.u32 %s232_s21, 4  ;;  %s117_s22 = int_to_ptr.vmem [resolvable:$true] %s116_s22 }
   0x8   :  { %v187_v13 = vpack.c.bf16 %v23_v12, %v22_v11  ;;  %v25_v15 = vld [vmem:[%s320_s1 + $0x48] sm:$0xff]  ;;  %v26_v17 = vld [vmem:[%s320_s1 + $0x50] sm:$0xff]  ;;  %v27_v18 = vld [vmem:[%s320_s1 + $0x58] sm:$0xff]  ;;  %s205_s23 = scalar_lea.vmem %s117_s22, 32  ;;  %p210_p1 = scmp.lt.s32.totalorder %s117_s22, %s117_s22 }
   0x9   :  { %v190_v16 = vpack.c.bf16 %v25_v15, %v24_v14  ;;  %v193_v19 = vpack.c.bf16 %v27_v18, %v26_v17  ;;  %v28_v20 = vld [vmem:[%s320_s1 + $0x60] sm:$0xff]  ;;  %v29_v21 = vld [vmem:[%s320_s1 + $0x68] sm:$0xff]  ;;  %v30_v23 = vld [vmem:[%s320_s1 + $0x70] sm:$0xff]  ;;  %p206_p0 = scmp.ne.s32.totalorder %s117_s22, %s205_s23  ;;  %p211_p2 = scmp.lt.s32.totalorder %s205_s23, %s205_s23 }
   0xa   :  { %v196_v22 = vpack.c.bf16 %v29_v21, %v28_v20  ;;  %v31_v24 = vld [vmem:[%s320_s1 + $0x78] sm:$0xff]  ;;  %v15_v26 = vld [vmem:[%s319_s0] sm:$0x3] }
   0xb   :  { %v199_v25 = vpack.c.bf16 %v31_v24, %v30_v23  ;;  %v124_v27 = vld [vmem:[%s321_s2] ss:$0 sm:$0xff]  ;;  %p212_p3 = por %p211_p2, %p210_p1 }
   0xc   :  { %182 = vmatpush3.bf16.xpose.msra.mxu0 %v181_v7 }
   0xd   :  { %183 = vmatprep.subr.bf16.mxu0 %v229_v2  ;;  %p213_p4 = pnand %p212_p3, %p206_p0 }
  0x14   :  { %185 = vmatpush3.bf16.xpose.msra.mxu0 %v184_v10 }
  0x15   :  { %186 = vmatprep.subr.bf16.mxu0 %v229_v2 }
  0x1c   :  { %188 = vmatpush3.bf16.xpose.msra.mxu0 %v187_v13 }
  0x1d   :  { %189 = vmatprep.subr.bf16.mxu0 %v229_v2 }
  0x24   :  { %191 = vmatpush3.bf16.xpose.msra.mxu0 %v190_v16 }
  0x25   :  { %192 = vmatprep.subr.bf16.mxu0 %v229_v2 }
  0x2c   :  { %194 = vmatpush3.bf16.xpose.msra.mxu0 %v193_v19 }
  0x2d   :  { %195 = vmatprep.subr.bf16.mxu0 %v229_v2 }
  0x34   :  { %197 = vmatpush3.bf16.xpose.msra.mxu0 %v196_v22 }
  0x35   :  { %198 = vmatprep.subr.bf16.mxu0 %v229_v2 }
  0x3c   :  { %200 = vmatpush3.bf16.xpose.msra.mxu0 %v199_v25 }
  0x43   :  { %175 = vmatmul.mubr.f32.vlgmr.msra.gmra.mrb[0].mxu0 %v15_v26 }
 0x116   :  { %v105_v28 = vpop.f32.mrb[0].mxu0 }
 0x117   :  { %v106_v29 = vadd.f32 %v124_v27, %v105_v28  ;;  %v176_v30 = vpop.f32.mrb[1].mxu0 }
 0x119   :  { %109 = vst [vmem:[#allocation2] sm:$0x3] %v106_v29 }
 0x11a   :  { %216 = shalt.err (!%p213_p4)
}
 0x11b   :  { %s217_s24 = scalar_lea.hbm %s322_s3, 32 }
 0x11c   :  { %p218_p5 = scmp.ne.s32.totalorder %s322_s3, %s217_s24  ;;  %p221_p6 = scmp.lt.u32.totalorder %s217_s24, %s322_s3 }
 0x11e   :  { %p223_p7 = pnand %p221_p6, %p218_p5 }
 0x120   :  { %226 = shalt.err (!%p223_p7)
}
 0x121   :  { %119 = dma.vmem_to_hbm [thread:$0]  %s117_s22, 32, %s322_s3, [#allocation3]  }
 0x122   :  { %227 = dma.done.wait [#allocation3], 32  }
 0x123   :  { %228 = vsyncadd [#allocation3], 4294967264 }
 0x124   :  { %123 = vsyncpa [#allocation3], 1 }

</bundles_post_ra>
